<compile_context>
chip_gen: v7x
topology: tpu7x:2x2x1
jax: 0.10.0
libtpu: 0.0.40
codegen_flags: <defaults>
</compile_context>

<pallas_src>
import math

import jax
import jax.numpy as jnp
from jax.experimental import pallas as pl
from jax.experimental.pallas import tpu as pltpu

# ---- synthetic GPTDolomiteConfig --------------------------------------------
HIDDEN = 32            # config.hidden_size
N_HEADS = 4            # config.num_attention_heads
HEAD_DIM = HIDDEN // N_HEADS
INTER = 4 * HIDDEN     # config.n_inner (default 4 * hidden_size)
SEQ = 8
BATCH = 2
EPS = 1e-5             # config.layer_norm_epsilon
M_RESIDUAL = 0.5       # config.m_residual (not None -> residual branch is scaled)
SOFTMAX_SCALE = 1.0 / math.sqrt(HEAD_DIM)

MXU_DTYPE = jnp.bfloat16   # MXU operand dtype; accumulation is f32 everywhere
NEG_INF = -1e30            # plain Python float (never a captured traced constant)


def _layernorm(x, gamma, beta):
    mu = jnp.mean(x, axis=-1, keepdims=True)
    var = jnp.mean(jnp.square(x - mu), axis=-1, keepdims=True)
    return (x - mu) * jax.lax.rsqrt(var + EPS) * gamma + beta


def _gelu_tanh(x):
    # gelu_pytorch_tanh (Dolomite default activation_function)
    return 0.5 * x * (1.0 + jnp.tanh(0.7978845608028654 * (x + 0.044715 * x * x * x)))


def _block_kernel(x_ref, bias_ref,
                  ln1_g_ref, ln1_b_ref,
                  wqkv_ref, bqkv_ref,
                  wo_ref, bo_ref,
                  ln2_g_ref, ln2_b_ref,
                  wfc_ref, bfc_ref,
                  wproj_ref, bproj_ref,
                  o_ref):
    S, H = x_ref.shape[1], x_ref.shape[2]
    x = x_ref[0].astype(jnp.float32)                          # (S, H) — one batch element

    # ---- ln_1 ----
    h = _layernorm(x, ln1_g_ref[...], ln1_b_ref[...])

    # ---- fused QKV projection: ONE MXU push, (S,H) @ (H,3H) ----
    qkv = jnp.dot(h.astype(MXU_DTYPE), wqkv_ref[...].astype(MXU_DTYPE),
                  preferred_element_type=jnp.float32) + bqkv_ref[...]      # (S, 3H)
    q = qkv[:, :H]
    k = qkv[:, H:2 * H]
    v = qkv[:, 2 * H:]

    # (S, H) -> (NH, S, HD): per-head split (static relayout of tiny tiles)
    def split_heads(t):
        return t.reshape(S, N_HEADS, HEAD_DIM).transpose(1, 0, 2)

    q3, k3, v3 = split_heads(q), split_heads(k), split_heads(v)

    # ---- head-batched attention with a plain causal additive bias ----
    scores = jnp.einsum('hqd,hkd->hqk', q3.astype(MXU_DTYPE), k3.astype(MXU_DTYPE),
                        preferred_element_type=jnp.float32) * SOFTMAX_SCALE
    scores = scores + bias_ref[...]                            # (S,S) broadcasts over heads
    scores = scores - jnp.max(scores, axis=-1, keepdims=True)
    p = jnp.exp(scores)
    p = p * pl.reciprocal(jnp.sum(p, axis=-1, keepdims=True), approx=True)  # EUP slot

    ctx = jnp.einsum('hqk,hkd->hqd', p.astype(MXU_DTYPE), v3.astype(MXU_DTYPE),
                     preferred_element_type=jnp.float32)       # (NH, S, HD)
    ctx = ctx.transpose(1, 0, 2).reshape(S, H)                 # head collect -> (S, H)

    # ---- output projection: ONE K=H matmul ----
    attn = jnp.dot(ctx.astype(MXU_DTYPE), wo_ref[...].astype(MXU_DTYPE),
                   preferred_element_type=jnp.float32) + bo_ref[...]
    if M_RESIDUAL is not None:
        attn = attn * M_RESIDUAL
    h1 = x + attn                                              # first residual

    # ---- ln_2 + MLP ----
    h2 = _layernorm(h1, ln2_g_ref[...], ln2_b_ref[...])
    m = jnp.dot(h2.astype(MXU_DTYPE), wfc_ref[...].astype(MXU_DTYPE),
                preferred_element_type=jnp.float32) + bfc_ref[...]
    m = _gelu_tanh(m)
    m = jnp.dot(m.astype(MXU_DTYPE), wproj_ref[...].astype(MXU_DTYPE),
                preferred_element_type=jnp.float32) + bproj_ref[...]
    if M_RESIDUAL is not None:
        m = m * M_RESIDUAL

    o_ref[0] = (h1 + m).astype(o_ref.dtype)                    # second residual


def gpt_dolomite_block(x, params):
    B, S, H = x.shape
    (ln1_g, ln1_b, wqkv, bqkv, wo, bo,
     ln2_g, ln2_b, wfc, bfc, wproj, bproj) = params

    # Additive causal-mask bias precomputed once in plain XLA (kernel input, not compute).
    causal_bias = jnp.where(jnp.tril(jnp.ones((S, S), dtype=bool)),
                            0.0, NEG_INF).astype(jnp.float32)

    def full_spec(shape):
        zeros = (0,) * len(shape)
        return pl.BlockSpec(shape, lambda b, _z=zeros: _z)     # resident across grid steps

    in_specs = [
        pl.BlockSpec((1, S, H), lambda b: (b, 0, 0)),          # hidden_states (one batch)
        full_spec((S, S)),                                     # causal bias
        full_spec(ln1_g.shape), full_spec(ln1_b.shape),
        full_spec(wqkv.shape), full_spec(bqkv.shape),
        full_spec(wo.shape), full_spec(bo.shape),
        full_spec(ln2_g.shape), full_spec(ln2_b.shape),
        full_spec(wfc.shape), full_spec(bfc.shape),
        full_spec(wproj.shape), full_spec(bproj.shape),
    ]

    out = pl.pallas_call(
        _block_kernel,
        out_shape=jax.ShapeDtypeStruct((B, S, H), x.dtype),
        grid=(B,),
        in_specs=in_specs,
        out_specs=pl.BlockSpec((1, S, H), lambda b: (b, 0, 0)),
        compiler_params=pltpu.CompilerParams(
            dimension_semantics=("parallel",)),                # v7x: shard batch over 2 TCs
    )(x, causal_bias, ln1_g, ln1_b, wqkv, bqkv, wo, bo,
      ln2_g, ln2_b, wfc, bfc, wproj, bproj)
    return out


# ---- pure-JAX reference (for correctness check) -----------------------------
def reference(x, params):
    (ln1_g, ln1_b, wqkv, bqkv, wo, bo,
     ln2_g, ln2_b, wfc, bfc, wproj, bproj) = params
    B, S, H = x.shape

    def ln(v, g, b):
        mu = v.mean(-1, keepdims=True)
        var = ((v - mu) ** 2).mean(-1, keepdims=True)
        return (v - mu) / jnp.sqrt(var + EPS) * g + b

    h = ln(x, ln1_g, ln1_b)
    qkv = h @ wqkv + bqkv
    q, k, v = jnp.split(qkv, 3, axis=-1)
    q = q.reshape(B, S, N_HEADS, HEAD_DIM).transpose(0, 2, 1, 3)
    k = k.reshape(B, S, N_HEADS, HEAD_DIM).transpose(0, 2, 1, 3)
    v = v.reshape(B, S, N_HEADS, HEAD_DIM).transpose(0, 2, 1, 3)
    scores = jnp.einsum("bhqd,bhkd->bhqk", q, k) * SOFTMAX_SCALE
    mask = jnp.tril(jnp.ones((S, S), dtype=bool))
    scores = jnp.where(mask, scores, NEG_INF)
    p = jax.nn.softmax(scores, axis=-1)
    attn = jnp.einsum("bhqk,bhkd->bhqd", p, v).transpose(0, 2, 1, 3).reshape(B, S, H)
    attn = attn @ wo + bo
    if M_RESIDUAL is not None:
        attn = attn * M_RESIDUAL
    h = x + attn
    residual = h
    h2 = ln(h, ln2_g, ln2_b)
    m = _gelu_tanh(h2 @ wfc + bfc)
    m = m @ wproj + bproj
    if M_RESIDUAL is not None:
        m = m * M_RESIDUAL
    return residual + m


def init_params(key):
    ks = jax.random.split(key, 8)
    std = 0.02
    ln1_g = jnp.ones((1, HIDDEN), jnp.float32)
    ln1_b = jnp.zeros((1, HIDDEN), jnp.float32)
    wqkv = std * jax.random.normal(ks[0], (HIDDEN, 3 * HIDDEN), jnp.float32)
    bqkv = std * jax.random.normal(ks[1], (1, 3 * HIDDEN), jnp.float32)
    wo = std * jax.random.normal(ks[2], (HIDDEN, HIDDEN), jnp.float32)
    bo = std * jax.random.normal(ks[3], (1, HIDDEN), jnp.float32)
    ln2_g = jnp.ones((1, HIDDEN), jnp.float32)
    ln2_b = jnp.zeros((1, HIDDEN), jnp.float32)
    wfc = std * jax.random.normal(ks[4], (HIDDEN, INTER), jnp.float32)
    bfc = std * jax.random.normal(ks[5], (1, INTER), jnp.float32)
    wproj = std * jax.random.normal(ks[6], (INTER, HIDDEN), jnp.float32)
    bproj = std * jax.random.normal(ks[7], (1, HIDDEN), jnp.float32)
    return (ln1_g, ln1_b, wqkv, bqkv, wo, bo,
            ln2_g, ln2_b, wfc, bfc, wproj, bproj)


if __name__ == "__main__":
    # TODO(synk): past_key_values cache, rope_cos_sin rotary embedding, and the
    # padding-free (cu_seqlens/max_seqlen) attention path are not implemented;
    # this covers the plain causal-SDPA forward of the block.
    key = jax.random.PRNGKey(0)
    kx, kp = jax.random.split(key)
    x = jax.random.normal(kx, (BATCH, SEQ, HIDDEN), jnp.float32)
    params = init_params(kp)

    out = gpt_dolomite_block(x, params)
    out = jax.block_until_ready(out)

    ref = reference(x, params)
    assert out.shape == (BATCH, SEQ, HIDDEN)
    # bf16 MXU operands + EUP approx reciprocal -> slightly looser tolerance than pure f32
    max_diff = float(jnp.max(jnp.abs(out - ref)))
    assert jnp.allclose(out, ref, atol=2e-3, rtol=2e-3), \
        f"mismatch vs JAX reference (max abs diff {max_diff:.3e})"

    print("KERNEL_OK")
</pallas_src>

<mosaic_0001>
module attributes {stable_mosaic.version = 11 : i64} {
  func.func @_block_kernel(%arg0: i32, %arg1: memref<1x8x32xf32, #tpu.memory_space<vmem>>, %arg2: memref<8x8xf32, #tpu.memory_space<vmem>>, %arg3: memref<1x32xf32, #tpu.memory_space<vmem>>, %arg4: memref<1x32xf32, #tpu.memory_space<vmem>>, %arg5: memref<32x96xf32, #tpu.memory_space<vmem>>, %arg6: memref<1x96xf32, #tpu.memory_space<vmem>>, %arg7: memref<32x32xf32, #tpu.memory_space<vmem>>, %arg8: memref<1x32xf32, #tpu.memory_space<vmem>>, %arg9: memref<1x32xf32, #tpu.memory_space<vmem>>, %arg10: memref<1x32xf32, #tpu.memory_space<vmem>>, %arg11: memref<32x128xf32, #tpu.memory_space<vmem>>, %arg12: memref<1x128xf32, #tpu.memory_space<vmem>>, %arg13: memref<128x32xf32, #tpu.memory_space<vmem>>, %arg14: memref<1x32xf32, #tpu.memory_space<vmem>>, %arg15: memref<1x8x32xf32, #tpu.memory_space<vmem>>) attributes {dimension_semantics = [#tpu.dimension_semantics<parallel>], iteration_bounds = array<i64: 2>, scalar_prefetch = 0 : i64, scratch_operands = 0 : i64, tpu.core_type = #tpu.core_type<tc>, window_params = [{transform_indices = @transform_0, window_bounds = array<i64: 1, 8, 32>}, {pipeline_mode = #tpu.pipeline_mode<synchronous>, transform_indices = @transform_1, window_bounds = array<i64: 8, 8>}, {pipeline_mode = #tpu.pipeline_mode<synchronous>, transform_indices = @transform_2, window_bounds = array<i64: 1, 32>}, {pipeline_mode = #tpu.pipeline_mode<synchronous>, transform_indices = @transform_3, window_bounds = array<i64: 1, 32>}, {pipeline_mode = #tpu.pipeline_mode<synchronous>, transform_indices = @transform_4, window_bounds = array<i64: 32, 96>}, {pipeline_mode = #tpu.pipeline_mode<synchronous>, transform_indices = @transform_5, window_bounds = array<i64: 1, 96>}, {pipeline_mode = #tpu.pipeline_mode<synchronous>, transform_indices = @transform_6, window_bounds = array<i64: 32, 32>}, {pipeline_mode = #tpu.pipeline_mode<synchronous>, transform_indices = @transform_7, window_bounds = array<i64: 1, 32>}, {pipeline_mode = #tpu.pipeline_mode<synchronous>, transform_indices = @transform_8, window_bounds = array<i64: 1, 32>}, {pipeline_mode = #tpu.pipeline_mode<synchronous>, transform_indices = @transform_9, window_bounds = array<i64: 1, 32>}, {pipeline_mode = #tpu.pipeline_mode<synchronous>, transform_indices = @transform_10, window_bounds = array<i64: 32, 128>}, {pipeline_mode = #tpu.pipeline_mode<synchronous>, transform_indices = @transform_11, window_bounds = array<i64: 1, 128>}, {pipeline_mode = #tpu.pipeline_mode<synchronous>, transform_indices = @transform_12, window_bounds = array<i64: 128, 32>}, {pipeline_mode = #tpu.pipeline_mode<synchronous>, transform_indices = @transform_13, window_bounds = array<i64: 1, 32>}, {transform_indices = @transform_14, window_bounds = array<i64: 1, 8, 32>}]} {
    %c0 = arith.constant 0 : index
    %c0_0 = arith.constant 0 : index
    %c0_1 = arith.constant 0 : index
    %0 = vector.load %arg1[%c0, %c0_0, %c0_1] : memref<1x8x32xf32, #tpu.memory_space<vmem>>, vector<1x8x32xf32>
    %1 = vector.shape_cast %0 : vector<1x8x32xf32> to vector<8x32xf32>
    %c0_2 = arith.constant 0 : index
    %c0_3 = arith.constant 0 : index
    %2 = vector.load %arg3[%c0_2, %c0_3] : memref<1x32xf32, #tpu.memory_space<vmem>>, vector<1x32xf32>
    %c0_4 = arith.constant 0 : index
    %c0_5 = arith.constant 0 : index
    %3 = vector.load %arg4[%c0_4, %c0_5] : memref<1x32xf32, #tpu.memory_space<vmem>>, vector<1x32xf32>
    %cst = arith.constant dense<0.000000e+00> : vector<8xf32>
    %4 = vector.multi_reduction <add>, %1, %cst [1] : vector<8x32xf32> to vector<8xf32>
    %5 = vector.shape_cast %4 : vector<8xf32> to vector<8x1xf32>
    %cst_6 = arith.constant 3.200000e+01 : f32
    %6 = vector.broadcast %cst_6 : f32 to vector<8x1xf32>
    %7 = arith.divf %5, %6 : vector<8x1xf32>
    %8 = vector.broadcast %7 : vector<8x1xf32> to vector<8x32xf32>
    %9 = arith.subf %1, %8 : vector<8x32xf32>
    %10 = arith.mulf %9, %9 : vector<8x32xf32>
    %cst_7 = arith.constant dense<0.000000e+00> : vector<8xf32>
    %11 = vector.multi_reduction <add>, %10, %cst_7 [1] : vector<8x32xf32> to vector<8xf32>
    %12 = vector.shape_cast %11 : vector<8xf32> to vector<8x1xf32>
    %cst_8 = arith.constant 3.200000e+01 : f32
    %13 = vector.broadcast %cst_8 : f32 to vector<8x1xf32>
    %14 = arith.divf %12, %13 : vector<8x1xf32>
    %15 = vector.broadcast %7 : vector<8x1xf32> to vector<8x32xf32>
    %16 = arith.subf %1, %15 : vector<8x32xf32>
    %cst_9 = arith.constant 9.99999974E-6 : f32
    %17 = vector.broadcast %cst_9 : f32 to vector<8x1xf32>
    %18 = arith.addf %14, %17 : vector<8x1xf32>
    %19 = math.rsqrt %18 : vector<8x1xf32>
    %20 = vector.broadcast %19 : vector<8x1xf32> to vector<8x32xf32>
    %21 = arith.mulf %16, %20 : vector<8x32xf32>
    %22 = vector.broadcast %2 : vector<1x32xf32> to vector<8x32xf32>
    %23 = arith.mulf %21, %22 : vector<8x32xf32>
    %24 = vector.broadcast %3 : vector<1x32xf32> to vector<8x32xf32>
    %25 = arith.addf %23, %24 : vector<8x32xf32>
    %26 = arith.truncf %25 : vector<8x32xf32> to vector<8x32xbf16>
    %c0_10 = arith.constant 0 : index
    %c0_11 = arith.constant 0 : index
    %27 = vector.load %arg5[%c0_10, %c0_11] : memref<32x96xf32, #tpu.memory_space<vmem>>, vector<32x96xf32>
    %28 = arith.truncf %27 : vector<32x96xf32> to vector<32x96xbf16>
    %cst_12 = arith.constant dense<0.000000e+00> : vector<8x96xf32>
    %29 = tpu.matmul %26, %28, %cst_12 {dimension_numbers = #tpu.dot_dimension_numbers<[1], [0], [0], [1], [0, 0, 1, 1], [], []>} : vector<8x32xbf16>, vector<32x96xbf16>, vector<8x96xf32> -> vector<8x96xf32>
    %c0_13 = arith.constant 0 : index
    %c0_14 = arith.constant 0 : index
    %30 = vector.load %arg6[%c0_13, %c0_14] : memref<1x96xf32, #tpu.memory_space<vmem>>, vector<1x96xf32>
    %31 = vector.broadcast %30 : vector<1x96xf32> to vector<8x96xf32>
    %32 = arith.addf %29, %31 : vector<8x96xf32>
    %33 = vector.extract_strided_slice %32 {offsets = [0, 0], sizes = [8, 32], strides = [1, 1]} : vector<8x96xf32> to vector<8x32xf32>
    %34 = vector.extract_strided_slice %32 {offsets = [0, 32], sizes = [8, 32], strides = [1, 1]} : vector<8x96xf32> to vector<8x32xf32>
    %35 = vector.extract_strided_slice %32 {offsets = [0, 64], sizes = [8, 32], strides = [1, 1]} : vector<8x96xf32> to vector<8x32xf32>
    %36 = vector.shape_cast %33 : vector<8x32xf32> to vector<8x4x8xf32>
    %37 = tpu.transpose %36, [1, 0, 2] : vector<8x4x8xf32> -> vector<4x8x8xf32>
    %38 = vector.shape_cast %34 : vector<8x32xf32> to vector<8x4x8xf32>
    %39 = tpu.transpose %38, [1, 0, 2] : vector<8x4x8xf32> -> vector<4x8x8xf32>
    %40 = vector.shape_cast %35 : vector<8x32xf32> to vector<8x4x8xf32>
    %41 = tpu.transpose %40, [1, 0, 2] : vector<8x4x8xf32> -> vector<4x8x8xf32>
    %42 = arith.truncf %37 : vector<4x8x8xf32> to vector<4x8x8xbf16>
    %43 = arith.truncf %39 : vector<4x8x8xf32> to vector<4x8x8xbf16>
    "tpu.trace_start"() <{level = 10 : i32, message = "hqd,hkd->hqk"}> : () -> ()
    %cst_15 = arith.constant dense<0.000000e+00> : vector<4x8x8xf32>
    %44 = tpu.matmul %42, %43, %cst_15 {dimension_numbers = #tpu.dot_dimension_numbers<[2], [2], [1], [1], [0, 0, 0, 1, 1, 1], [0], [0]>} : vector<4x8x8xbf16>, vector<4x8x8xbf16>, vector<4x8x8xf32> -> vector<4x8x8xf32>
    "tpu.trace_stop"() : () -> ()
    %cst_16 = arith.constant 0.353553385 : f32
    %45 = vector.broadcast %cst_16 : f32 to vector<4x8x8xf32>
    %46 = arith.mulf %44, %45 : vector<4x8x8xf32>
    %c0_17 = arith.constant 0 : index
    %c0_18 = arith.constant 0 : index
    %47 = vector.load %arg2[%c0_17, %c0_18] : memref<8x8xf32, #tpu.memory_space<vmem>>, vector<8x8xf32>
    %48 = vector.shape_cast %47 : vector<8x8xf32> to vector<1x8x8xf32>
    %49 = vector.broadcast %48 : vector<1x8x8xf32> to vector<4x8x8xf32>
    %50 = arith.addf %46, %49 : vector<4x8x8xf32>
    %cst_19 = arith.constant dense<0xFF800000> : vector<4x8xf32>
    %51 = vector.multi_reduction <maximumf>, %50, %cst_19 [2] : vector<4x8x8xf32> to vector<4x8xf32>
    %52 = vector.shape_cast %51 : vector<4x8xf32> to vector<4x8x1xf32>
    %53 = vector.broadcast %52 : vector<4x8x1xf32> to vector<4x8x8xf32>
    %54 = arith.subf %50, %53 : vector<4x8x8xf32>
    %55 = math.exp %54 : vector<4x8x8xf32>
    %cst_20 = arith.constant dense<0.000000e+00> : vector<4x8xf32>
    %56 = vector.multi_reduction <add>, %55, %cst_20 [2] : vector<4x8x8xf32> to vector<4x8xf32>
    %57 = vector.shape_cast %56 : vector<4x8xf32> to vector<4x8x1xf32>
    %58 = tpu.reciprocal %57 {approx = true} : vector<4x8x1xf32> -> vector<4x8x1xf32>
    %59 = vector.broadcast %58 : vector<4x8x1xf32> to vector<4x8x8xf32>
    %60 = arith.mulf %55, %59 : vector<4x8x8xf32>
    %61 = arith.truncf %60 : vector<4x8x8xf32> to vector<4x8x8xbf16>
    %62 = arith.truncf %41 : vector<4x8x8xf32> to vector<4x8x8xbf16>
    "tpu.trace_start"() <{level = 10 : i32, message = "hqk,hkd->hqd"}> : () -> ()
    %cst_21 = arith.constant dense<0.000000e+00> : vector<4x8x8xf32>
    %63 = tpu.matmul %61, %62, %cst_21 {dimension_numbers = #tpu.dot_dimension_numbers<[2], [1], [1], [2], [0, 0, 0, 1, 1, 2], [0], [0]>} : vector<4x8x8xbf16>, vector<4x8x8xbf16>, vector<4x8x8xf32> -> vector<4x8x8xf32>
    "tpu.trace_stop"() : () -> ()
    %64 = tpu.transpose %63, [1, 0, 2] : vector<4x8x8xf32> -> vector<8x4x8xf32>
    %65 = vector.shape_cast %64 : vector<8x4x8xf32> to vector<8x32xf32>
    %66 = arith.truncf %65 : vector<8x32xf32> to vector<8x32xbf16>
    %c0_22 = arith.constant 0 : index
    %c0_23 = arith.constant 0 : index
    %67 = vector.load %arg7[%c0_22, %c0_23] : memref<32x32xf32, #tpu.memory_space<vmem>>, vector<32x32xf32>
    %68 = arith.truncf %67 : vector<32x32xf32> to vector<32x32xbf16>
    %cst_24 = arith.constant dense<0.000000e+00> : vector<8x32xf32>
    %69 = tpu.matmul %66, %68, %cst_24 {dimension_numbers = #tpu.dot_dimension_numbers<[1], [0], [0], [1], [0, 0, 1, 1], [], []>} : vector<8x32xbf16>, vector<32x32xbf16>, vector<8x32xf32> -> vector<8x32xf32>
    %c0_25 = arith.constant 0 : index
    %c0_26 = arith.constant 0 : index
    %70 = vector.load %arg8[%c0_25, %c0_26] : memref<1x32xf32, #tpu.memory_space<vmem>>, vector<1x32xf32>
    %71 = vector.broadcast %70 : vector<1x32xf32> to vector<8x32xf32>
    %72 = arith.addf %69, %71 : vector<8x32xf32>
    %cst_27 = arith.constant 5.000000e-01 : f32
    %73 = vector.broadcast %cst_27 : f32 to vector<8x32xf32>
    %74 = arith.mulf %72, %73 : vector<8x32xf32>
    %75 = arith.addf %1, %74 : vector<8x32xf32>
    %c0_28 = arith.constant 0 : index
    %c0_29 = arith.constant 0 : index
    %76 = vector.load %arg9[%c0_28, %c0_29] : memref<1x32xf32, #tpu.memory_space<vmem>>, vector<1x32xf32>
    %c0_30 = arith.constant 0 : index
    %c0_31 = arith.constant 0 : index
    %77 = vector.load %arg10[%c0_30, %c0_31] : memref<1x32xf32, #tpu.memory_space<vmem>>, vector<1x32xf32>
    %cst_32 = arith.constant dense<0.000000e+00> : vector<8xf32>
    %78 = vector.multi_reduction <add>, %75, %cst_32 [1] : vector<8x32xf32> to vector<8xf32>
    %79 = vector.shape_cast %78 : vector<8xf32> to vector<8x1xf32>
    %cst_33 = arith.constant 3.200000e+01 : f32
    %80 = vector.broadcast %cst_33 : f32 to vector<8x1xf32>
    %81 = arith.divf %79, %80 : vector<8x1xf32>
    %82 = vector.broadcast %81 : vector<8x1xf32> to vector<8x32xf32>
    %83 = arith.subf %75, %82 : vector<8x32xf32>
    %84 = arith.mulf %83, %83 : vector<8x32xf32>
    %cst_34 = arith.constant dense<0.000000e+00> : vector<8xf32>
    %85 = vector.multi_reduction <add>, %84, %cst_34 [1] : vector<8x32xf32> to vector<8xf32>
    %86 = vector.shape_cast %85 : vector<8xf32> to vector<8x1xf32>
    %cst_35 = arith.constant 3.200000e+01 : f32
    %87 = vector.broadcast %cst_35 : f32 to vector<8x1xf32>
    %88 = arith.divf %86, %87 : vector<8x1xf32>
    %89 = vector.broadcast %81 : vector<8x1xf32> to vector<8x32xf32>
    %90 = arith.subf %75, %89 : vector<8x32xf32>
    %cst_36 = arith.constant 9.99999974E-6 : f32
    %91 = vector.broadcast %cst_36 : f32 to vector<8x1xf32>
    %92 = arith.addf %88, %91 : vector<8x1xf32>
    %93 = math.rsqrt %92 : vector<8x1xf32>
    %94 = vector.broadcast %93 : vector<8x1xf32> to vector<8x32xf32>
    %95 = arith.mulf %90, %94 : vector<8x32xf32>
    %96 = vector.broadcast %76 : vector<1x32xf32> to vector<8x32xf32>
    %97 = arith.mulf %95, %96 : vector<8x32xf32>
    %98 = vector.broadcast %77 : vector<1x32xf32> to vector<8x32xf32>
    %99 = arith.addf %97, %98 : vector<8x32xf32>
    %100 = arith.truncf %99 : vector<8x32xf32> to vector<8x32xbf16>
    %c0_37 = arith.constant 0 : index
    %c0_38 = arith.constant 0 : index
    %101 = vector.load %arg11[%c0_37, %c0_38] : memref<32x128xf32, #tpu.memory_space<vmem>>, vector<32x128xf32>
    %102 = arith.truncf %101 : vector<32x128xf32> to vector<32x128xbf16>
    %cst_39 = arith.constant dense<0.000000e+00> : vector<8x128xf32>
    %103 = tpu.matmul %100, %102, %cst_39 {dimension_numbers = #tpu.dot_dimension_numbers<[1], [0], [0], [1], [0, 0, 1, 1], [], []>} : vector<8x32xbf16>, vector<32x128xbf16>, vector<8x128xf32> -> vector<8x128xf32>
    %c0_40 = arith.constant 0 : index
    %c0_41 = arith.constant 0 : index
    %104 = vector.load %arg12[%c0_40, %c0_41] : memref<1x128xf32, #tpu.memory_space<vmem>>, vector<1x128xf32>
    %105 = vector.broadcast %104 : vector<1x128xf32> to vector<8x128xf32>
    %106 = arith.addf %103, %105 : vector<8x128xf32>
    %cst_42 = arith.constant 5.000000e-01 : f32
    %107 = vector.broadcast %cst_42 : f32 to vector<8x128xf32>
    %108 = arith.mulf %107, %106 : vector<8x128xf32>
    %cst_43 = arith.constant 4.471500e-02 : f32
    %109 = vector.broadcast %cst_43 : f32 to vector<8x128xf32>
    %110 = arith.mulf %109, %106 : vector<8x128xf32>
    %111 = arith.mulf %110, %106 : vector<8x128xf32>
    %112 = arith.mulf %111, %106 : vector<8x128xf32>
    %113 = arith.addf %106, %112 : vector<8x128xf32>
    %cst_44 = arith.constant 0.797884583 : f32
    %114 = vector.broadcast %cst_44 : f32 to vector<8x128xf32>
    %115 = arith.mulf %114, %113 : vector<8x128xf32>
    %116 = math.tanh %115 : vector<8x128xf32>
    %cst_45 = arith.constant 1.000000e+00 : f32
    %117 = vector.broadcast %cst_45 : f32 to vector<8x128xf32>
    %118 = arith.addf %117, %116 : vector<8x128xf32>
    %119 = arith.mulf %108, %118 : vector<8x128xf32>
    %120 = arith.truncf %119 : vector<8x128xf32> to vector<8x128xbf16>
    %c0_46 = arith.constant 0 : index
    %c0_47 = arith.constant 0 : index
    %121 = vector.load %arg13[%c0_46, %c0_47] : memref<128x32xf32, #tpu.memory_space<vmem>>, vector<128x32xf32>
    %122 = arith.truncf %121 : vector<128x32xf32> to vector<128x32xbf16>
    %cst_48 = arith.constant dense<0.000000e+00> : vector<8x32xf32>
    %123 = tpu.matmul %120, %122, %cst_48 {dimension_numbers = #tpu.dot_dimension_numbers<[1], [0], [0], [1], [0, 0, 1, 1], [], []>} : vector<8x128xbf16>, vector<128x32xbf16>, vector<8x32xf32> -> vector<8x32xf32>
    %c0_49 = arith.constant 0 : index
    %c0_50 = arith.constant 0 : index
    %124 = vector.load %arg14[%c0_49, %c0_50] : memref<1x32xf32, #tpu.memory_space<vmem>>, vector<1x32xf32>
    %125 = vector.broadcast %124 : vector<1x32xf32> to vector<8x32xf32>
    %126 = arith.addf %123, %125 : vector<8x32xf32>
    %cst_51 = arith.constant 5.000000e-01 : f32
    %127 = vector.broadcast %cst_51 : f32 to vector<8x32xf32>
    %128 = arith.mulf %126, %127 : vector<8x32xf32>
    %129 = arith.addf %75, %128 : vector<8x32xf32>
    %c0_52 = arith.constant 0 : index
    %c0_53 = arith.constant 0 : index
    %c0_54 = arith.constant 0 : index
    %130 = vector.load %arg15[%c0_52, %c0_53, %c0_54] : memref<1x8x32xf32, #tpu.memory_space<vmem>>, vector<1x8x32xf32>
    %131 = vector.shape_cast %130 : vector<1x8x32xf32> to vector<8x32xf32>
    %132 = vector.shape_cast %129 : vector<8x32xf32> to vector<1x8x32xf32>
    tpu.vector_store %arg15[%c0_52, %c0_53, %c0_54], %132 {strides = array<i32>} : memref<1x8x32xf32, #tpu.memory_space<vmem>>, vector<1x8x32xf32>,
    return
  }
  func.func @transform_0(%arg0: i32) -> (i32, i32, i32) {
    %c0_i32 = arith.constant 0 : i32
    %c0_i32_0 = arith.constant 0 : i32
    %c0_i32_1 = arith.constant 0 : i32
    return %arg0, %c0_i32, %c0_i32_0 : i32, i32, i32
  }
  func.func @transform_1(%arg0: i32) -> (i32, i32) {
    %c0_i32 = arith.constant 0 : i32
    %c0_i32_0 = arith.constant 0 : i32
    %c0_i32_1 = arith.constant 0 : i32
    return %c0_i32, %c0_i32_0 : i32, i32
  }
  func.func @transform_2(%arg0: i32) -> (i32, i32) {
    %c0_i32 = arith.constant 0 : i32
    %c0_i32_0 = arith.constant 0 : i32
    %c0_i32_1 = arith.constant 0 : i32
    return %c0_i32, %c0_i32_0 : i32, i32
  }
  func.func @transform_3(%arg0: i32) -> (i32, i32) {
    %c0_i32 = arith.constant 0 : i32
    %c0_i32_0 = arith.constant 0 : i32
    %c0_i32_1 = arith.constant 0 : i32
    return %c0_i32, %c0_i32_0 : i32, i32
  }
  func.func @transform_4(%arg0: i32) -> (i32, i32) {
    %c0_i32 = arith.constant 0 : i32
    %c0_i32_0 = arith.constant 0 : i32
    %c0_i32_1 = arith.constant 0 : i32
    return %c0_i32, %c0_i32_0 : i32, i32
  }
  func.func @transform_5(%arg0: i32) -> (i32, i32) {
    %c0_i32 = arith.constant 0 : i32
    %c0_i32_0 = arith.constant 0 : i32
    %c0_i32_1 = arith.constant 0 : i32
    return %c0_i32, %c0_i32_0 : i32, i32
  }
  func.func @transform_6(%arg0: i32) -> (i32, i32) {
    %c0_i32 = arith.constant 0 : i32
    %c0_i32_0 = arith.constant 0 : i32
    %c0_i32_1 = arith.constant 0 : i32
    return %c0_i32, %c0_i32_0 : i32, i32
  }
  func.func @transform_7(%arg0: i32) -> (i32, i32) {
    %c0_i32 = arith.constant 0 : i32
    %c0_i32_0 = arith.constant 0 : i32
    %c0_i32_1 = arith.constant 0 : i32
    return %c0_i32, %c0_i32_0 : i32, i32
  }
  func.func @transform_8(%arg0: i32) -> (i32, i32) {
    %c0_i32 = arith.constant 0 : i32
    %c0_i32_0 = arith.constant 0 : i32
    %c0_i32_1 = arith.constant 0 : i32
    return %c0_i32, %c0_i32_0 : i32, i32
  }
  func.func @transform_9(%arg0: i32) -> (i32, i32) {
    %c0_i32 = arith.constant 0 : i32
    %c0_i32_0 = arith.constant 0 : i32
    %c0_i32_1 = arith.constant 0 : i32
    return %c0_i32, %c0_i32_0 : i32, i32
  }
  func.func @transform_10(%arg0: i32) -> (i32, i32) {
    %c0_i32 = arith.constant 0 : i32
    %c0_i32_0 = arith.constant 0 : i32
    %c0_i32_1 = arith.constant 0 : i32
    return %c0_i32, %c0_i32_0 : i32, i32
  }
  func.func @transform_11(%arg0: i32) -> (i32, i32) {
    %c0_i32 = arith.constant 0 : i32
    %c0_i32_0 = arith.constant 0 : i32
    %c0_i32_1 = arith.constant 0 : i32
    return %c0_i32, %c0_i32_0 : i32, i32
  }
  func.func @transform_12(%arg0: i32) -> (i32, i32) {
    %c0_i32 = arith.constant 0 : i32
    %c0_i32_0 = arith.constant 0 : i32
    %c0_i32_1 = arith.constant 0 : i32
    return %c0_i32, %c0_i32_0 : i32, i32
  }
  func.func @transform_13(%arg0: i32) -> (i32, i32) {
    %c0_i32 = arith.constant 0 : i32
    %c0_i32_0 = arith.constant 0 : i32
    %c0_i32_1 = arith.constant 0 : i32
    return %c0_i32, %c0_i32_0 : i32, i32
  }
  func.func @transform_14(%arg0: i32) -> (i32, i32, i32) {
    %c0_i32 = arith.constant 0 : i32
    %c0_i32_0 = arith.constant 0 : i32
    %c0_i32_1 = arith.constant 0 : i32
    return %arg0, %c0_i32, %c0_i32_0 : i32, i32, i32
  }
}

</mosaic_0001>

<bundles_post_ra>
// kernel: tpu_custom_call.1
= control target key start
LH: loop header
LB: loop body
LE: loop exit
PB: predicated region body
PF: predicated region fallthrough
CT: control target
= control target key end

     0   :  { %s2688_s0 = inlined_call_operand.vmem [shape: f32[2,8,32], index: 0, kind: input, shape index: {}]   ;;  %s2689_s1 = inlined_call_operand.vmem [shape: f32[8,8], index: 1, kind: input, shape index: {}]   ;;  %s2690_s2 = inlined_call_operand.vmem [shape: f32[1,32], index: 2, kind: input, shape index: {}]   ;;  %s2691_s3 = inlined_call_operand.vmem [shape: f32[1,32], index: 3, kind: input, shape index: {}]   ;;  %s2692_s4 = inlined_call_operand.vmem [shape: f32[32,96], index: 4, kind: input, shape index: {}]   ;;  %s2693_s5 = inlined_call_operand.vmem [shape: f32[1,96], index: 5, kind: input, shape index: {}]   ;;  %s2694_s6 = inlined_call_operand.vmem [shape: f32[32,32], index: 6, kind: input, shape index: {}]   ;;  %s2695_s7 = inlined_call_operand.vmem [shape: f32[1,32], index: 7, kind: input, shape index: {}]   ;;  %s2696_s8 = inlined_call_operand.vmem [shape: f32[1,32], index: 8, kind: input, shape index: {}]   ;;  %s2697_s9 = inlined_call_operand.vmem [shape: f32[1,32], index: 9, kind: input, shape index: {}]   ;;  %s2698_s10 = inlined_call_operand.vmem [shape: f32[32,128], index: 10, kind: input, shape index: {}]   ;;  %s2699_s11 = inlined_call_operand.vmem [shape: f32[1,128], index: 11, kind: input, shape index: {}]   ;;  %s2700_s12 = inlined_call_operand.vmem [shape: f32[128,32], index: 12, kind: input, shape index: {}]   ;;  %s2701_s13 = inlined_call_operand.vmem [shape: f32[1,32], index: 13, kind: input, shape index: {}]   ;;  %s2702_s14 = inlined_call_operand.hbm [shape: f32[2,8,32], index: 14, kind: output, shape index: {}]  }
   0x1   :  { %2703 = sst [smem:[#allocation5_spill]] %s2688_s0 }
   0x2   :  { %2704 = sst [smem:[#allocation6_spill]] %s2689_s1 }
   0x3   :  { %2705 = sst [smem:[#allocation7_spill]] %s2690_s2 }
   0x4   :  { %2706 = sst [smem:[#allocation8_spill]] %s2691_s3 }
   0x5   :  { %19 = vsyncpa [#allocation3], 0 }
   0x6   :  { %21 = vsyncpa [#allocation3 + $0x1], 0  ;;  %s2277_s29 = smov 0   ;;  %s2279_s30 = smov 0  }
   0x7   :  { %s2281_s15 = smov 0   ;;  %s2283_s16 = smov 0  }
   0x8 LB: > { %s2298_s17 = sadd.s32 4294967295, %s2187_s16   ;;  %s1889_s18 = sadd.s32 4294967294, %s2187_s16   ;;  %s2187_s16 = sphi %s2283_s16, %s2716_s16   ;;  %s2183_s15 = sphi %s2281_s15, %s2715_s15   ;;  %s2179_s30 = sphi %s2279_s30, %s2714_s30   ;;  %s2175_s29 = sphi %s2277_s29, %s2713_s29  }
   0x9   : > { %s2302_s19 = sadd.s32 1, %s2187_s16   ;;  %s333_s20 = sadd.s32 1, %s2183_s15 }
   0xa   : > { %s330_s21 = ssub.s32 %s2187_s16, %s2302_s19  ;;  %p343_p0 = scmp.ne.s32.totalorder %s2183_s15, %s2179_s30 }
   0xb   : > { %p331_p1 = scmp.eq.s32.totalorder %s330_s21, 0  ;;  %p344_p2 = scmp.eq.s32.totalorder %s2298_s17, 1 }
   0xc   : > { %p349_p3 = scmp.ne.s32.totalorder %s2179_s30, %s2175_s29  ;;  %p350_p4 = scmp.eq.s32.totalorder %s1889_s18, 1 }
   0xd   : > { %s2313_s22 = scalar_select %p331_p1, %s2183_s15, %s333_s20  }
   0xe   : > { %p2315_p5 = por %p344_p2, %p343_p0  ;;  %p2319_p6 = por %p350_p4, %p349_p3 }
   0xf   : > { %p1892_p7 = scmp.ge.s32.totalorder %s2187_s16, 1  ;;  %p414_p8 = scmp.lt.s32.totalorder %s2187_s16, 3 }
  0x11   : > { %p415_p9 = pnand %p1892_p7, %p414_p8 }
  0x12   : > { %p459_p10 = scmp.lt.s32.totalorder (!%p415_p9), %s2298_s17, 1  ;;  %vm467_vm0 = vcmask (!%p415_p9), 261120   ;;  %s2709_s0 = sld [smem:[#allocation5_spill]] (!%p415_p9)  ;;  %v497_v7 = vld [vmem:[%s2692_s4] sm:$0xff] (!%p415_p9)  ;;  %v498_v8 = vld [vmem:[%s2692_s4 + $0x8] sm:$0xff] (!%p415_p9)  ;;  %v499_v9 = vld [vmem:[%s2692_s4 + $0x10] sm:$0xff] (!%p415_p9)  ;;  %v568_v35 = vlaneseq (!%p415_p9) }
  0x13   : > { %418 = sbr.rel (%p415_p9) target bundleno = 2777 (0xad9), region = 76  ;;  %v2189_v10 = vmov (!%p415_p9), 0.0   ;;  %v501_v11 = vpack.c.bf16 (!%p415_p9), %v498_v8, %v497_v7  ;;  %v500_v12 = vld [vmem:[%s2692_s4 + $0x18] sm:$0xff] (!%p415_p9)  ;;  %vm2190_vm1 = vmmov (!%p415_p9), 0   ;;  %s2710_s2 = sld [smem:[#allocation7_spill]] (!%p415_p9)  ;;  %vm1003_vm2 = vcmask (!%p415_p9), 64512  }
  0x14   : > { %1960 = vmatprep.subr.bf16.mxu0 (!%p415_p9), %v2189_v10  ;;  %1964 = vmatprep.mubr.msk.bf16.mxu0 (!%p415_p9), %vm2190_vm1, %v2189_v10  ;;  %v502_v13 = vpack.c.bf16 (!%p415_p9), %v500_v12, %v499_v9  ;;  %s2711_s3 = sld [smem:[#allocation8_spill]] (!%p415_p9)  ;;  %v1897_v24 = vld [vmem:[%s2693_s5] ss:$0 sm:$0xff] (!%p415_p9)  ;;  %s2191_s28 = smov (!%p415_p9), 104   ;;  %v2195_v33 = vmov (!%p415_p9), 1983009808  }
  0x15   : > { %1980 = vmatprep.subr.bf16.mxu1 (!%p415_p9), %v2189_v10  ;;  %1982 = vmatprep.mubr.msk.bf16.mxu1 (!%p415_p9), %vm2190_vm1, %v2189_v10  ;;  %s2194_s20 = smov (!%p415_p9), 96   ;;  %v566_v34 = vunpack.c.l.s4 (!%p415_p9), %v2195_v33  ;;  %v569_v37 = vshrl.u32 (!%p415_p9), %v568_v35, 7  ;;  %v2196_v39 = vmov (!%p415_p9), 1934713408   ;;  %s2712_s1 = sld [smem:[#allocation6_spill]] (!%p415_p9)  ;;  %vm1252_vm3 = vcmask (!%p415_p9), 1043456  }
  0x16   : > { %1961 = vmatpush3.bf16.msra.mxu0 (!%p415_p9), %v501_v11  ;;  %v598_v40 = vunpack.c.l.s4 (!%p415_p9), %v2196_v39  ;;  %s2198_s27 = smov (!%p415_p9), 16   ;;  %vm1583_vm4 = vcmask (!%p415_p9), 130048   ;;  %vm1585_vm5 = vcmask (!%p415_p9), 195584  }
  0x17   : > { %1962 = vmatprep.subr.bf16.mxu0 (!%p415_p9), %v2189_v10  ;;  %v567_v36 = vunpack.c.0.s8 (!%p415_p9), %v566_v34 }
  0x18   : > { %v599_v47 = vunpack.c.0.s8 (!%p415_p9), %v598_v40 }
  0x19   : > { %v1895_v18 = vld [vmem:[%s2710_s2] ss:$0 sm:$0xff] (!%p415_p9)  ;;  %v2387_v43 = vsub.s32 (!%p415_p9), %v567_v36, %v569_v37 }
  0x1a   : > { %s460_s25 = scalar_select %p459_p10, %s2298_s17, 1  ;;  %1963 = vmatpush3.bf16.msra.mxu0 %v502_v13  ;;  %v1896_v20 = vld [vmem:[%s2711_s3] ss:$0 sm:$0xff]  ;;  %v2397_v53 = vsub.s32 %v599_v47, %v569_v37 }
  0x1b   : > { %1968 = vmatprep.subr.bf16.mxu0 %v2189_v10 }
  0x1c   : > { %s1894_s26 = sshll.u32 %s460_s25, 3 }
  0x1d   : > { %s462_s18 = scalar_lea.vmem %s2709_s0, %s1894_s26  ;;  %s2193_s0 = smov 112  }
  0x1e   : > { %v2330_v0 = vld [vmem:[%s462_s18] sm:$0xff]  ;;  %s2192_s18 = smov 120   ;;  %s2197_s26 = smov 64  }
  0x1f   : > { %v468_v1 = vsel %vm467_vm0, %v2330_v0, 0.0 }
  0x20   : > { %469 = vadd.xlane.f32.xlu0 %v468_v1 }
  0xad   : > { %v470_v2 = vpop.xlane.xlu0 %469 }
  0xae   : > { %v472_v3 = vmul.f32 0.03125, %v470_v2 }
  0xb0   : > { %v473_v4 = vsub.f32 %v2330_v0, %v472_v3 }
  0xb2   : > { %v474_v5 = vmul.f32 %v473_v4, %v473_v4 }
  0xb4   : > { %v475_v6 = vsel %vm467_vm0, %v474_v5, 0.0 }
  0xb5   : > { %476 = vadd.xlane.f32.xlu0 %v475_v6 }
 0x142   : > { %v477_v14 = vpop.xlane.xlu0 %476 }
 0x143   : > { %v478_v15 = vmul.f32 0.03125, %v477_v14 }
 0x145   : > { %v479_v16 = vadd.f32 1e-05, %v478_v15 }
 0x147   : > { %2103 = vrsqrt.f32 %v479_v16 }
 0x151   : > { %v2104_v17 = vpop.eup %2103 }
 0x152   : > { %v481_v19 = vmul.f32 %v2104_v17, %v473_v4 }
 0x154   : > { %v488_v21 = vmul.f32 %v1895_v18, %v481_v19 }
 0x156   : > { %v495_v22 = vadd.f32 %v1896_v20, %v488_v21 }
 0x158   : > { %v496_v23 = vpack.c.bf16 %v495_v22, %v495_v22 }
 0x15a   : > { %1965 = vmatmul.mubr.msk.bf16.vlgmr.msra.gmra.mrb[0].mxu0 %vm467_vm0, %v496_v23 }
 0x15b   : > { %1970 = vmatprep.mubr.msk.bf16.mxu0 %vm2190_vm1, %v2189_v10 }
 0x22d   : > { %v547_v25 = vpop.f32.mrb[0].mxu0 }
 0x22e   : > { %v2368_v26 = vadd.f32 %v1897_v24, %v547_v25  ;;  %v1966_v27 = vpop.f32.mrb[1].mxu0 }
 0x22f   : > { %v550_v28 = vpop.f32.mrb[2].mxu0 }
 0x230   : > { %560 = vrot.lane.b32.xlu0 %v2368_v26, %s2191_s28  ;;  %554 = vrot.lane.b32.xlu1 %v2368_v26, %s2192_s18  ;;  %v1967_v29 = vpop.f32.mrb[3].mxu0  ;;  %s2199_s28 = smov 8   ;;  %s2200_s18 = smov 24  }
 0x234   : > { %557 = vrot.lane.b32.xlu1 %v2368_v26, %s2193_s0 }
 0x238   : > { %699 = vrot.lane.b32.xlu1 %v2368_v26, %s2194_s20 }
 0x2a2   : > { %v2374_v30 = vpop.permute.xlu1 %554  ;;  %v2380_v32 = vpop.permute.xlu0 %560 }
 0x2a3   : > { %701 = vrot.lane.b32.xlu1 %v2374_v30, %s2194_s20  ;;  %v579_v44 = vcombine.low %v2374_v30, %v2380_v32  ;;  %v580_v45 = vcombine.high %v2374_v30, %v2380_v32 }
 0x2a5   : > { %v587_v50 = vrot.slane %v579_v44, %v2387_v43  ;;  %v594_v51 = vrot.slane %v580_v45, %v2387_v43 }
 0x2a6   : > { %v2377_v31 = vpop.permute.xlu1 %557 }
 0x2a7   : > { %703 = vrot.lane.b32.xlu1 %v2377_v31, %s2194_s20  ;;  %v563_v41 = vcombine.low %v2368_v26, %v2377_v31  ;;  %v564_v42 = vcombine.high %v2368_v26, %v2377_v31 }
 0x2a9   : > { %v571_v48 = vrot.slane %v563_v41, %v2387_v43  ;;  %v578_v49 = vrot.slane %v564_v42, %v2387_v43 }
 0x2aa   : > { %v700_v38 = vpop.permute.xlu1 %699 }
 0x2ab   : > { %705 = vrot.lane.b32.xlu1 %v2380_v32, %s2194_s20  ;;  %v595_v54 = vcombine.low %v571_v48, %v587_v50  ;;  %v596_v55 = vcombine.high %v571_v48, %v587_v50  ;;  %v611_v56 = vcombine.low %v578_v49, %v594_v51  ;;  %v612_v57 = vcombine.high %v578_v49, %v594_v51  ;;  %s1923_s20 = sshll.u32 %s2298_s17, 7 }
 0x2ac   : > { %s2645_s2 = scalar_lea.hbm %s2702_s14, %s1923_s20 }
 0x2ad   : > { %v603_v63 = vrot.slane %v595_v54, %v2397_v53  ;;  %v610_v1 = vrot.slane %v596_v55, %v2397_v53  ;;  %v619_v2 = vrot.slane %v611_v56, %v2397_v53  ;;  %v626_v3 = vrot.slane %v612_v57, %v2397_v53 }
 0x2af   : > { %v631_v13 = vcombine.low %v603_v63, %v610_v1  ;;  %v1899_v14 = vcombine.high %v603_v63, %v610_v1  ;;  %v647_v15 = vcombine.low %v619_v2, %v626_v3  ;;  %v1900_v16 = vcombine.high %v619_v2, %v626_v3 }
 0x2b1   : > { %v638_v25 = vrot.slane %v631_v13, %v2387_v43  ;;  %v646_v27 = vrot.slane %v1899_v14, %v2387_v43  ;;  %v654_v28 = vrot.slane %v647_v15, %v2387_v43  ;;  %v662_v29 = vrot.slane %v1900_v16, %v2387_v43  ;;  %v1192_v15 = vld [vmem:[%s2712_s1] sm:$0xff] }
 0x2b3   : > { %v663_v41 = vcombine.low %v638_v25, %v646_v27  ;;  %v679_v42 = vcombine.low %v654_v28, %v662_v29  ;;  %v664_v44 = vcombine.high %v638_v25, %v646_v27  ;;  %v680_v45 = vcombine.high %v654_v28, %v662_v29 }
 0x2b5   : > { %v687_v54 = vrot.slane %v679_v42, %v2397_v53  ;;  %v678_v57 = vrot.slane %v664_v44, %v2397_v53 }
 0x315   : > { %v702_v46 = vpop.permute.xlu1 %701 }
 0x319   : > { %v704_v52 = vpop.permute.xlu1 %703 }
 0x31a   : > { %v711_v58 = vcombine.low %v700_v38, %v704_v52  ;;  %v712_v59 = vcombine.high %v700_v38, %v704_v52  ;;  %v671_v52 = vrot.slane %v663_v41, %v2397_v53 }
 0x31c   : > { %v719_v4 = vrot.slane %v711_v58, %v2387_v43  ;;  %v726_v5 = vrot.slane %v712_v59, %v2387_v43  ;;  %v694_v58 = vrot.slane %v680_v45, %v2397_v53 }
 0x31d   : > { %v706_v60 = vpop.permute.xlu1 %705 }
 0x31e   : > { %v727_v61 = vcombine.low %v702_v46, %v706_v60  ;;  %v728_v62 = vcombine.high %v702_v46, %v706_v60  ;;  %v697_v63 = vcombine.low %v678_v57, %v694_v58 }
 0x320   : > { %v735_v6 = vrot.slane %v727_v61, %v2387_v43  ;;  %v742_v7 = vrot.slane %v728_v62, %v2387_v43  ;;  %v695_v62 = vcombine.low %v671_v52, %v687_v54  ;;  %v997_v3 = vpack.c.bf16 %v697_v63, %v697_v63 }
 0x322   : > { %v743_v8 = vcombine.low %v719_v4, %v735_v6  ;;  %v744_v9 = vcombine.high %v719_v4, %v735_v6  ;;  %v759_v11 = vcombine.low %v726_v5, %v742_v7  ;;  %v760_v12 = vcombine.high %v726_v5, %v742_v7 }
 0x323   : > { %v995_v2 = vpack.c.bf16 %v695_v62, %v695_v62  ;;  %v696_v6 = vcombine.high %v671_v52, %v687_v54 }
 0x324   : > { %v751_v17 = vrot.slane %v743_v8, %v2397_v53  ;;  %v758_v18 = vrot.slane %v744_v9, %v2397_v53  ;;  %v767_v19 = vrot.slane %v759_v11, %v2397_v53  ;;  %v774_v20 = vrot.slane %v760_v12, %v2397_v53 }
 0x325   : > { %v996_v8 = vpack.c.bf16 %v696_v6, %v696_v6  ;;  %v698_v11 = vcombine.high %v678_v57, %v694_v58 }
 0x326   : > { %v779_v21 = vcombine.low %v751_v17, %v758_v18  ;;  %v1901_v22 = vcombine.high %v751_v17, %v758_v18  ;;  %v795_v23 = vcombine.low %v767_v19, %v774_v20  ;;  %v1902_v24 = vcombine.high %v767_v19, %v774_v20 }
 0x327   : > { %v998_v12 = vpack.c.bf16 %v698_v11, %v698_v11 }
 0x328   : > { %v786_v33 = vrot.slane %v779_v21, %v2387_v43  ;;  %v794_v34 = vrot.slane %v1901_v22, %v2387_v43  ;;  %v802_v35 = vrot.slane %v795_v23, %v2387_v43  ;;  %v810_v36 = vrot.slane %v1902_v24, %v2387_v43 }
 0x32a   : > { %v811_v37 = vcombine.low %v786_v33, %v794_v34  ;;  %v827_v38 = vcombine.low %v802_v35, %v810_v36  ;;  %v812_v39 = vcombine.high %v786_v33, %v794_v34  ;;  %v828_v40 = vcombine.high %v802_v35, %v810_v36 }
 0x32c   : > { %v819_v46 = vrot.slane %v811_v37, %v2397_v53  ;;  %v835_v47 = vrot.slane %v827_v38, %v2397_v53  ;;  %v826_v48 = vrot.slane %v812_v39, %v2397_v53  ;;  %v842_v49 = vrot.slane %v828_v40, %v2397_v53 }
 0x32e   : > { %v843_v50 = vcombine.low %v819_v46, %v835_v47  ;;  %v845_v51 = vcombine.low %v826_v48, %v842_v49  ;;  %v844_v61 = vcombine.high %v819_v46, %v835_v47  ;;  %v846_v5 = vcombine.high %v826_v48, %v842_v49 }
 0x330   : > { %v999_v55 = vpack.c.bf16 %v843_v50, %v843_v50  ;;  %v1001_v56 = vpack.c.bf16 %v845_v51, %v845_v51  ;;  %v1000_v1 = vpack.c.bf16 %v844_v61, %v844_v61  ;;  %v1002_v7 = vpack.c.bf16 %v846_v5, %v846_v5 }
 0x332   : > { %v1008_v59 = vsel %vm1003_vm2, %v999_v55, 0  ;;  %v1100_v60 = vsel %vm1003_vm2, %v1001_v56, 0  ;;  %v1054_v4 = vsel %vm1003_vm2, %v1000_v1, 0  ;;  %v1146_v9 = vsel %vm1003_vm2, %v1002_v7, 0 }
 0x333   : > { %1969 = vmatpush3.bf16.xpose.msra.mxu0 %v1008_v59  ;;  %1981 = vmatpush3.bf16.xpose.msra.mxu1 %v1100_v60 }
 0x334   : > { %1974 = vmatprep.subr.bf16.mxu0 %v2189_v10  ;;  %1992 = vmatprep.subr.bf16.mxu1 %v2189_v10 }
 0x33a   : > { %1971 = vmatmul.mubr.msk.bf16.vlgmr.msra.gmra.mrb[4].mxu0 %vm1003_vm2, %v995_v2  ;;  %1983 = vmatmul.mubr.msk.bf16.vlgmr.msra.gmra.mrb[0].mxu1 %vm1003_vm2, %v997_v3 }
 0x33b   : > { %1975 = vmatpush3.bf16.xpose.msra.mxu0 %v1054_v4  ;;  %1976 = vmatprep.mubr.msk.bf16.mxu0 %vm2190_vm1, %v2189_v10 }
 0x33c   : > { %1986 = vmatprep.subr.bf16.mxu0 %v2189_v10  ;;  %1994 = vmatprep.mubr.msk.bf16.mxu1 %vm2190_vm1, %v2189_v10 }
 0x342   : > { %1977 = vmatmul.mubr.msk.bf16.vlgmr.msra.gmra.mrb[8].mxu0 %vm1003_vm2, %v996_v8 }
 0x343   : > { %1987 = vmatpush3.bf16.xpose.msra.mxu0 %v1146_v9  ;;  %1988 = vmatprep.mubr.msk.bf16.mxu0 %vm2190_vm1, %v2189_v10 }
 0x344   : > { %1998 = vmatprep.subr.bf16.mxu0 %v2189_v10 }
 0x34a   : > { %1989 = vmatmul.mubr.msk.bf16.vlgmr.msra.gmra.mrb[12].mxu0 %vm1003_vm2, %v998_v12 }
 0x34b   : > { %2000 = vmatprep.mubr.msk.bf16.mxu0 %vm2190_vm1, %v2189_v10 }
 0x40d   : > { %v1044_v13 = vpop.f32.mrb[4].mxu0  ;;  %v1136_v14 = vpop.f32.mrb[0].mxu1 }
 0x40e   : > { %v1188_v16 = vmul.f32 0.35355338, %v1044_v13  ;;  %v1190_v17 = vmul.f32 0.35355338, %v1136_v14  ;;  %v1972_v18 = vpop.f32.mrb[5].mxu0  ;;  %v1984_v19 = vpop.f32.mrb[1].mxu1 }
 0x40f   : > { %v1047_v20 = vpop.f32.mrb[6].mxu0  ;;  %v1139_v21 = vpop.f32.mrb[2].mxu1 }
 0x410   : > { %v1973_v22 = vpop.f32.mrb[7].mxu0  ;;  %v1985_v23 = vpop.f32.mrb[3].mxu1  ;;  %v1193_v24 = vadd.f32 %v1192_v15, %v1188_v16  ;;  %v1195_v27 = vadd.f32 %v1192_v15, %v1190_v17 }
 0x412   : > { %v1197_v25 = vsel %vm1003_vm2, %v1193_v24, -inf  ;;  %v1203_v34 = vsel %vm1003_vm2, %v1195_v27, -inf }
 0x413   : > { %1198 = vmax.xlane.f32.xlu1 %v1197_v25 }
 0x415   : > { %v1090_v28 = vpop.f32.mrb[8].mxu0 }
 0x416   : > { %v1189_v29 = vmul.f32 0.35355338, %v1090_v28  ;;  %v1978_v33 = vpop.f32.mrb[9].mxu0 }
 0x417   : > { %1204 = vmax.xlane.f32.xlu1 %v1203_v34  ;;  %v1093_v35 = vpop.f32.mrb[10].mxu0 }
 0x418   : > { %v1979_v36 = vpop.f32.mrb[11].mxu0  ;;  %v1194_v37 = vadd.f32 %v1192_v15, %v1189_v29 }
 0x41a   : > { %v1200_v38 = vsel %vm1003_vm2, %v1194_v37, -inf }
 0x41b   : > { %1201 = vmax.xlane.f32.xlu0 %v1200_v38 }
 0x41d   : > { %v1182_v39 = vpop.f32.mrb[12].mxu0 }
 0x41e   : > { %v1191_v40 = vmul.f32 0.35355338, %v1182_v39  ;;  %v1990_v41 = vpop.f32.mrb[13].mxu0 }
 0x41f   : > { %v1185_v42 = vpop.f32.mrb[14].mxu0 }
 0x420   : > { %v1991_v44 = vpop.f32.mrb[15].mxu0  ;;  %v1196_v45 = vadd.f32 %v1192_v15, %v1191_v40 }
 0x422   : > { %v1206_v46 = vsel %vm1003_vm2, %v1196_v45, -inf }
 0x423   : > { %1207 = vmax.xlane.f32.xlu0 %v1206_v46 }
 0x428   : > { %847 = vrot.lane.b32.xlu1 %v2368_v26, %s2197_s26 }
 0x4a0   : > { %v1199_v47 = vpop.xlane.xlu1 %1198 }
 0x4a1   : > { %v1209_v48 = vsub.f32 %v1193_v24, %v1199_v47 }
 0x4a3   : > { %v1213_v49 = vmul.f32 1.442695, %v1209_v48 }
 0x4a4   : > { %v1205_v59 = vpop.xlane.xlu1 %1204 }
 0x4a5   : > { %2105 = vpow2.f32 %v1213_v49  ;;  %v1211_v60 = vsub.f32 %v1195_v27, %v1205_v59 }
 0x4a7   : > { %v1217_v62 = vmul.f32 1.442695, %v1211_v60 }
 0x4a8   : > { %v1202_v50 = vpop.xlane.xlu0 %1201 }
 0x4a9   : > { %v1210_v51 = vsub.f32 %v1194_v37, %v1202_v50 }
 0x4ab   : > { %v1215_v52 = vmul.f32 1.442695, %v1210_v51 }
 0x4ad   : > { %2107 = vpow2.f32 %v1215_v52 }
 0x4af   : > { %v2455_v54 = vpop.eup %2105 }
 0x4b0   : > { %v1221_v55 = vsel %vm1003_vm2, %v2455_v54, 0.0  ;;  %v1208_v26 = vpop.xlane.xlu0 %1207 }
 0x4b1   : > { %1222 = vadd.xlane.f32.xlu1 %v1221_v55  ;;  %v1212_v58 = vsub.f32 %v1196_v45, %v1208_v26 }
 0x4b3   : > { %v1219_v61 = vmul.f32 1.442695, %v1212_v58 }
 0x4b5   : > { %2109 = vpow2.f32 %v1219_v61 }
 0x4b6   : > { %2111 = vpow2.f32 %v1217_v62 }
 0x4b7   : > { %v2459_v56 = vpop.eup %2107 }
 0x4b8   : > { %v1224_v57 = vsel %vm1003_vm2, %v2459_v56, 0.0 }
 0x4b9   : > { %1225 = vadd.xlane.f32.xlu0 %v1224_v57 }
 0x4bf   : > { %v2466_v63 = vpop.eup %2109 }
 0x4c0   : > { %v1230_v1 = vsel %vm1003_vm2, %v2466_v63, 0.0  ;;  %v2470_v2 = vpop.eup %2111 }
 0x4c2   : > { %851 = vrot.lane.b32.xlu1 %v2377_v31, %s2197_s26  ;;  %v1227_v31 = vsel %vm1003_vm2, %v2470_v2, 0.0 }
 0x4c6   : > { %853 = vrot.lane.b32.xlu1 %v2380_v32, %s2197_s26 }
 0x4cf   : > { %849 = vrot.lane.b32.xlu0 %v2374_v30, %s2197_s26  ;;  %v848_v30 = vpop.permute.xlu1 %847 }
 0x4ea   : > { %1231 = vadd.xlane.f32.xlu1 %v1230_v1 }
 0x4ee   : > { %1228 = vadd.xlane.f32.xlu0 %v1227_v31 }
 0x53e   : > { %v1223_v32 = vpop.xlane.xlu1 %1222 }
 0x53f   : > { %2113 = vrcp.f32 %v1223_v32 }
 0x542   : > { %v852_v3 = vpop.permute.xlu1 %851 }
 0x543   : > { %v859_v5 = vcombine.low %v848_v30, %v852_v3  ;;  %v860_v6 = vcombine.high %v848_v30, %v852_v3 }
 0x545   : > { %v867_v12 = vrot.slane %v859_v5, %v2387_v43  ;;  %v874_v13 = vrot.slane %v860_v6, %v2387_v43 }
 0x546   : > { %v1226_v4 = vpop.xlane.xlu0 %1225  ;;  %v854_v7 = vpop.permute.xlu1 %853 }
 0x547   : > { %2115 = vrcp.f32 %v1226_v4 }
 0x549   : > { %v2114_v40 = vpop.eup %2113 }
 0x54a   : > { %v850_v8 = vpop.permute.xlu0 %849  ;;  %v1237_v51 = vmul.f32 %v2114_v40, %v2455_v54 }
 0x54b   : > { %v875_v9 = vcombine.low %v850_v8, %v854_v7  ;;  %v876_v11 = vcombine.high %v850_v8, %v854_v7 }
 0x54c   : > { %v1241_v61 = vpack.c.bf16 %v1237_v51, %v1237_v51 }
 0x54d   : > { %v883_v14 = vrot.slane %v875_v9, %v2387_v43  ;;  %v890_v15 = vrot.slane %v876_v11, %v2387_v43 }
 0x54f   : > { %v891_v16 = vcombine.low %v867_v12, %v883_v14  ;;  %v892_v17 = vcombine.high %v867_v12, %v883_v14  ;;  %v907_v18 = vcombine.low %v874_v13, %v890_v15  ;;  %v908_v19 = vcombine.high %v874_v13, %v890_v15 }
 0x551   : > { %v899_v20 = vrot.slane %v891_v16, %v2397_v53  ;;  %v906_v21 = vrot.slane %v892_v17, %v2397_v53  ;;  %v915_v22 = vrot.slane %v907_v18, %v2397_v53  ;;  %v922_v23 = vrot.slane %v908_v19, %v2397_v53  ;;  %v2116_v46 = vpop.eup %2115 }
 0x552   : > { %v1238_v52 = vmul.f32 %v2116_v46, %v2459_v56  ;;  %v1590_v46 = vld [vmem:[%s2694_s6 + $0x10] sm:$0xff] }
 0x553   : > { %v927_v24 = vcombine.low %v899_v20, %v906_v21  ;;  %v1903_v25 = vcombine.high %v899_v20, %v906_v21  ;;  %v943_v27 = vcombine.low %v915_v22, %v922_v23  ;;  %v1904_v28 = vcombine.high %v915_v22, %v922_v23 }
 0x554   : > { %v1242_v62 = vpack.c.bf16 %v1238_v52, %v1238_v52 }
 0x555   : > { %v934_v29 = vrot.slane %v927_v24, %v2387_v43  ;;  %v942_v33 = vrot.slane %v1903_v25, %v2387_v43  ;;  %v950_v34 = vrot.slane %v943_v27, %v2387_v43  ;;  %v958_v35 = vrot.slane %v1904_v28, %v2387_v43 }
 0x557   : > { %v959_v36 = vcombine.low %v934_v29, %v942_v33  ;;  %v975_v37 = vcombine.low %v950_v34, %v958_v35  ;;  %v960_v38 = vcombine.high %v934_v29, %v942_v33  ;;  %v976_v39 = vcombine.high %v950_v34, %v958_v35  ;;  %v1588_v34 = vld [vmem:[%s2694_s6] sm:$0xff]  ;;  %v1589_v35 = vld [vmem:[%s2694_s6 + $0x8] sm:$0xff] }
 0x559   : > { %v967_v41 = vrot.slane %v959_v36, %v2397_v53  ;;  %v983_v42 = vrot.slane %v975_v37, %v2397_v53  ;;  %v974_v44 = vrot.slane %v960_v38, %v2397_v53  ;;  %v990_v45 = vrot.slane %v976_v39, %v2397_v53 }
 0x55a   : > { %v1592_v36 = vpack.c.bf16 %v1589_v35, %v1588_v34 }
 0x55b   : > { %v991_v47 = vcombine.low %v967_v41, %v983_v42  ;;  %v992_v48 = vcombine.high %v967_v41, %v983_v42  ;;  %v993_v49 = vcombine.low %v974_v44, %v990_v45  ;;  %v994_v50 = vcombine.high %v974_v44, %v990_v45 }
 0x55d   : > { %v1245_v55 = vpack.c.bf16 %v991_v47, %v991_v47  ;;  %v1246_v57 = vpack.c.bf16 %v992_v48, %v992_v48  ;;  %v1247_v59 = vpack.c.bf16 %v993_v49, %v993_v49  ;;  %v1248_v60 = vpack.c.bf16 %v994_v50, %v994_v50  ;;  %v1591_v47 = vld [vmem:[%s2694_s6 + $0x18] sm:$0xff] }
 0x55e   : > { %v1593_v48 = vpack.c.bf16 %v1591_v47, %v1590_v46  ;;  %v1744_v46 = vld [vmem:[%s2700_s12 + $0x10] sm:$0xff]  ;;  %v1745_v47 = vld [vmem:[%s2700_s12 + $0x18] sm:$0xff] }
 0x55f   : > { %v1254_v26 = vsel %vm1252_vm3, %v1245_v55, 0  ;;  %v1300_v58 = vsel %vm1252_vm3, %v1246_v57, 0  ;;  %v1346_v54 = vsel %vm1252_vm3, %v1247_v59, 0  ;;  %v1392_v56 = vsel %vm1252_vm3, %v1248_v60, 0 }
 0x560   : > { %1993 = vmatpush3.bf16.msra.mxu1 %v1254_v26  ;;  %1999 = vmatpush3.bf16.msra.mxu0 %v1300_v58 }
 0x561   : > { %2004 = vmatprep.subr.bf16.mxu1 %v2189_v10  ;;  %2010 = vmatprep.subr.bf16.mxu0 %v2189_v10 }
 0x563   : > { %1995 = vmatmul.mubr.msk.bf16.vlgmr.msra.gmra.mrb[4].mxu1 %vm1003_vm2, %v1241_v61  ;;  %2001 = vmatmul.mubr.msk.bf16.vlgmr.msra.gmra.mrb[16].mxu0 %vm1003_vm2, %v1242_v62 }
 0x564   : > { %2005 = vmatpush3.bf16.msra.mxu1 %v1346_v54  ;;  %2011 = vmatpush3.bf16.msra.mxu0 %v1392_v56 }
 0x565   : > { %2012 = vmatprep.mubr.msk.bf16.mxu0 %vm2190_vm1, %v2189_v10  ;;  %2006 = vmatprep.mubr.msk.bf16.mxu1 %vm2190_vm1, %v2189_v10 }
 0x566   : > { %2016 = vmatprep.subr.bf16.mxu1 %v2189_v10  ;;  %2024 = vmatprep.subr.bf16.mxu0 %v2189_v10 }
 0x577   : > { %v1232_v1 = vpop.xlane.xlu1 %1231 }
 0x578   : > { %2117 = vrcp.f32 %v1232_v1 }
 0x57b   : > { %v1229_v31 = vpop.xlane.xlu0 %1228 }
 0x57c   : > { %2119 = vrcp.f32 %v1229_v31 }
 0x582   : > { %v2118_v30 = vpop.eup %2117 }
 0x583   : > { %v1240_v32 = vmul.f32 %v2118_v30, %v2466_v63 }
 0x585   : > { %v1244_v3 = vpack.c.bf16 %v1240_v32, %v1240_v32 }
 0x586   : > { %v2120_v4 = vpop.eup %2119 }
 0x587   : > { %v1239_v5 = vmul.f32 %v2120_v4, %v2470_v2  ;;  %2013 = vmatmul.mubr.msk.bf16.vlgmr.msra.gmra.mrb[20].mxu0 %vm1003_vm2, %v1244_v3 }
 0x588   : > { %2028 = vmatprep.mubr.msk.bf16.mxu0 %vm2190_vm1, %v2189_v10 }
 0x589   : > { %v1243_v6 = vpack.c.bf16 %v1239_v5, %v1239_v5 }
 0x58b   : > { %2007 = vmatmul.mubr.msk.bf16.vlgmr.msra.gmra.mrb[8].mxu1 %vm1003_vm2, %v1243_v6 }
 0x58c   : > { %2020 = vmatprep.mubr.msk.bf16.mxu1 %vm2190_vm1, %v2189_v10  ;;  %2017 = vmatpush3.bf16.msra.mxu1 %v1592_v36 }
 0x58d   : > { %2018 = vmatprep.subr.bf16.mxu1 %v2189_v10 }
 0x590   : > { %2019 = vmatpush3.bf16.msra.mxu1 %v1593_v48  ;;  %v1759_v48 = vpack.c.bf16 %v1745_v47, %v1744_v46 }
 0x591   : > { %2032 = vmatprep.subr.bf16.mxu1 %v2189_v10 }
 0x636   : > { %v1290_v7 = vpop.f32.mrb[4].mxu1  ;;  %v1336_v8 = vpop.f32.mrb[16].mxu0 }
 0x637   : > { %v1996_v9 = vpop.f32.mrb[5].mxu1  ;;  %v2002_v11 = vpop.f32.mrb[17].mxu0 }
 0x638   : > { %v1293_v63 = vpop.f32.mrb[6].mxu1  ;;  %v1339_v12 = vpop.f32.mrb[18].mxu0  ;;  %v1915_v11 = vld [vmem:[%s2695_s7] ss:$0 sm:$0xff] }
 0x639   : > { %v1997_v13 = vpop.f32.mrb[7].mxu1  ;;  %v2003_v14 = vpop.f32.mrb[19].mxu0 }
 0x65a   : > { %v1428_v2 = vpop.f32.mrb[20].mxu0 }
 0x65b   : > { %v1450_v15 = vcombine.low %v1336_v8, %v1428_v2  ;;  %v1451_v16 = vcombine.high %v1336_v8, %v1428_v2  ;;  %v2014_v17 = vpop.f32.mrb[21].mxu0 }
 0x65c   : > { %v1431_v18 = vpop.f32.mrb[22].mxu0 }
 0x65d   : > { %v2015_v19 = vpop.f32.mrb[23].mxu0  ;;  %v1458_v25 = vrot.slane %v1450_v15, %v2387_v43  ;;  %v1465_v27 = vrot.slane %v1451_v16, %v2387_v43 }
 0x65e   : > { %v1382_v20 = vpop.f32.mrb[8].mxu1 }
 0x65f   : > { %v1434_v21 = vcombine.low %v1290_v7, %v1382_v20  ;;  %v1435_v22 = vcombine.high %v1290_v7, %v1382_v20  ;;  %v2008_v23 = vpop.f32.mrb[9].mxu1 }
 0x660   : > { %v1385_v24 = vpop.f32.mrb[10].mxu1  ;;  %v1676_v23 = vld [vmem:[%s2698_s10] sm:$0xff] }
 0x661   : > { %v1442_v28 = vrot.slane %v1434_v21, %v2387_v43  ;;  %v1449_v29 = vrot.slane %v1435_v22, %v2387_v43  ;;  %v2009_v33 = vpop.f32.mrb[11].mxu1 }
 0x662   : > { %v1743_v33 = vld [vmem:[%s2700_s12 + $0x8] sm:$0xff] }
 0x663   : > { %v1466_v37 = vcombine.low %v1442_v28, %v1458_v25  ;;  %v1467_v38 = vcombine.high %v1442_v28, %v1458_v25  ;;  %v1482_v39 = vcombine.low %v1449_v29, %v1465_v27  ;;  %v1483_v40 = vcombine.high %v1449_v29, %v1465_v27  ;;  %v1678_v25 = vld [vmem:[%s2698_s10 + $0x10] sm:$0xff]  ;;  %v1679_v27 = vld [vmem:[%s2698_s10 + $0x18] sm:$0xff]  ;;  %v1742_v29 = vld [vmem:[%s2700_s12] sm:$0xff] }
 0x664   : > { %v1681_v28 = vpack.c.bf16 %v1679_v27, %v1678_v25  ;;  %v1758_v34 = vpack.c.bf16 %v1743_v33, %v1742_v29 }
 0x665   : > { %v1474_v41 = vrot.slane %v1466_v37, %v2397_v53  ;;  %v1481_v42 = vrot.slane %v1467_v38, %v2397_v53  ;;  %v1490_v44 = vrot.slane %v1482_v39, %v2397_v53  ;;  %v1497_v45 = vrot.slane %v1483_v40, %v2397_v53  ;;  %v1917_v39 = vld [vmem:[%s2696_s8] ss:$0 sm:$0xff] }
 0x667   : > { %v1502_v49 = vcombine.low %v1474_v41, %v1481_v42  ;;  %v1913_v50 = vcombine.high %v1474_v41, %v1481_v42  ;;  %v1518_v51 = vcombine.low %v1490_v44, %v1497_v45  ;;  %v1914_v52 = vcombine.high %v1490_v44, %v1497_v45  ;;  %v1918_v41 = vld [vmem:[%s2697_s9] ss:$0 sm:$0xff] }
 0x669   : > { %v1509_v55 = vrot.slane %v1502_v49, %v2387_v43  ;;  %v1517_v57 = vrot.slane %v1913_v50, %v2387_v43  ;;  %v1525_v26 = vrot.slane %v1518_v51, %v2387_v43  ;;  %v1533_v58 = vrot.slane %v1914_v52, %v2387_v43  ;;  %v1746_v49 = vld [vmem:[%s2700_s12 + $0x20] sm:$0xff]  ;;  %v1747_v50 = vld [vmem:[%s2700_s12 + $0x28] sm:$0xff]  ;;  %v1748_v52 = vld [vmem:[%s2700_s12 + $0x30] sm:$0xff] }
 0x66a   : > { %v1760_v51 = vpack.c.bf16 %v1747_v50, %v1746_v49 }
 0x66b   : > { %v1535_v59 = vcombine.high %v1509_v55, %v1517_v57  ;;  %v1551_v60 = vcombine.high %v1525_v26, %v1533_v58  ;;  %v1534_v61 = vcombine.low %v1509_v55, %v1517_v57  ;;  %v1550_v62 = vcombine.low %v1525_v26, %v1533_v58  ;;  %v1749_v55 = vld [vmem:[%s2700_s12 + $0x38] sm:$0xff]  ;;  %v1750_v26 = vld [vmem:[%s2700_s12 + $0x40] sm:$0xff]  ;;  %v1751_v58 = vld [vmem:[%s2700_s12 + $0x48] sm:$0xff] }
 0x66c   : > { %v1761_v57 = vpack.c.bf16 %v1749_v55, %v1748_v52 }
 0x66d   : > { %v1549_v54 = vrot.slane %v1535_v59, %v2397_v53  ;;  %v1565_v56 = vrot.slane %v1551_v60, %v2397_v53  ;;  %v1542_v1 = vrot.slane %v1534_v61, %v2397_v53  ;;  %v1558_v31 = vrot.slane %v1550_v62, %v2397_v53  ;;  %v1752_v60 = vld [vmem:[%s2700_s12 + $0x50] sm:$0xff]  ;;  %v1753_v61 = vld [vmem:[%s2700_s12 + $0x58] sm:$0xff] }
 0x66e   : > { %v1762_v59 = vpack.c.bf16 %v1751_v58, %v1750_v26  ;;  %v1763_v62 = vpack.c.bf16 %v1753_v61, %v1752_v60 }
 0x66f   : > { %v1568_v30 = vcombine.low %v1549_v54, %v1565_v56  ;;  %v1567_v32 = vcombine.high %v1542_v1, %v1558_v31  ;;  %v1569_v3 = vcombine.high %v1549_v54, %v1565_v56  ;;  %v1566_v4 = vcombine.low %v1542_v1, %v1558_v31  ;;  %v1754_v54 = vld [vmem:[%s2700_s12 + $0x60] sm:$0xff]  ;;  %v1755_v56 = vld [vmem:[%s2700_s12 + $0x68] sm:$0xff]  ;;  %v1756_v31 = vld [vmem:[%s2700_s12 + $0x70] sm:$0xff] }
 0x670   : > { %v1764_v1 = vpack.c.bf16 %v1755_v56, %v1754_v54 }
 0x671   : > { %1575 = vrot.lane.b32.xlu1 %v1568_v30, %s2198_s27  ;;  %1571 = vrot.lane.b32.xlu0 %v1567_v32, %s2199_s28  ;;  %v1757_v30 = vld [vmem:[%s2700_s12 + $0x78] sm:$0xff]  ;;  %s456_s27 = sand.u32 1, %s2179_s30  }
 0x672   : > { %v1765_v32 = vpack.c.bf16 %v1757_v30, %v1756_v31  ;;  %s1893_s28 = sshll.u32 %s456_s27, 3 }
 0x673   : > { %s458_s21 = scalar_lea.vmem [#allocation2], %s1893_s28  ;;  %s2201_s28 = smov [#allocation2]  }
 0x674   : > { %s1830_s25 = sshll.u32 %s458_s21, 4  ;;  %s2129_s0 = sshll.u32 %s2201_s28, 4  ;;  %s2647_s25 = int_to_ptr.vmem [resolvable:$true] %s1830_s25  ;;  %s2130_s0 = int_to_ptr.vmem [resolvable:$false] %s2129_s0 }
 0x675   : > { %1579 = vrot.lane.b32.xlu0 %v1569_v3, %s2200_s18  ;;  %v1919_v3 = vld [vmem:[%s2699_s11] ss:$0 sm:$0xff]  ;;  %s1817_s18 = scalar_lea.sflag [#allocation3], %s456_s27  ;;  %s2125_s17 = scalar_lea.vmem %s2647_s25, 128 }
 0x676   : > { %p2126_p11 = scmp.ne.s32.totalorder %s2647_s25, %s2125_s17  ;;  %s2131_s3 = scalar_lea.vmem %s2130_s0, 256 }
 0x677   : > { %p2132_p0 = scmp.lt.s32.totalorder %s2647_s25, %s2130_s0  ;;  %p2133_p1 = scmp.lt.s32.totalorder %s2131_s3, %s2125_s17 }
 0x678   : > { %p2127_p12 = pnand %p2126_p11, %p2315_p5 }
 0x679   : > { %p2134_p2 = por %p2133_p1, %p2132_p0 }
 0x67a   : > { %p2128_p13 = pneg %p2127_p12 }
 0x67c   : > { %p2135_p3 = pnand %p2134_p2, %p2128_p13 }
 0x6e3   : > { %v1572_v43 = vpop.permute.xlu0 %1571  ;;  %v1576_v5 = vpop.permute.xlu1 %1575 }
 0x6e4   : > { %v1582_v6 = vsel %vm1003_vm2, %v1566_v4, %v1572_v43 }
 0x6e5   : > { %v1584_v8 = vsel %vm1583_vm4, %v1582_v6, %v1576_v5 }
 0x6e7   : > { %v1580_v7 = vpop.permute.xlu0 %1579 }
 0x6e8   : > { %v1586_v9 = vsel %vm1585_vm5, %v1584_v8, %v1580_v7 }
 0x6e9   : > { %v1587_v53 = vpack.c.bf16 %v1586_v9, %v1586_v9 }
 0x6eb   : > { %2021 = vmatmul.mubr.msk.bf16.vlgmr.msra.gmra.mrb[12].mxu1 %vm467_vm0, %v1587_v53 }
 0x6ec   : > { %2048 = vmatprep.mubr.msk.bf16.mxu1 %vm2190_vm1, %v2189_v10  ;;  %2033 = vmatpush3.bf16.msra.mxu1 %v1758_v34 }
 0x6ed   : > { %2034 = vmatprep.subr.bf16.mxu1 %v2189_v10 }
 0x6f0   : > { %2035 = vmatpush3.bf16.msra.mxu1 %v1759_v48 }
 0x6f1   : > { %2036 = vmatprep.subr.bf16.mxu1 %v2189_v10 }
 0x6f4   : > { %2037 = vmatpush3.bf16.msra.mxu1 %v1760_v51 }
 0x6f5   : > { %2038 = vmatprep.subr.bf16.mxu1 %v2189_v10 }
 0x6f8   : > { %2039 = vmatpush3.bf16.msra.mxu1 %v1761_v57 }
 0x6f9   : > { %2040 = vmatprep.subr.bf16.mxu1 %v2189_v10 }
 0x6fc   : > { %2041 = vmatpush3.bf16.msra.mxu1 %v1762_v59 }
 0x6fd   : > { %2042 = vmatprep.subr.bf16.mxu1 %v2189_v10 }
 0x700   : > { %2043 = vmatpush3.bf16.msra.mxu1 %v1763_v62 }
 0x701   : > { %2044 = vmatprep.subr.bf16.mxu1 %v2189_v10 }
 0x704   : > { %2045 = vmatpush3.bf16.msra.mxu1 %v1764_v1 }
 0x705   : > { %2046 = vmatprep.subr.bf16.mxu1 %v2189_v10 }
 0x708   : > { %2047 = vmatpush3.bf16.msra.mxu1 %v1765_v32 }
 0x7be   : > { %v1638_v63 = vpop.f32.mrb[12].mxu1 }
 0x7bf   : > { %v1639_v12 = vadd.f32 %v1915_v11, %v1638_v63  ;;  %v2022_v13 = vpop.f32.mrb[13].mxu1 }
 0x7c0   : > { %v1641_v14 = vpop.f32.mrb[14].mxu1 }
 0x7c1   : > { %v1644_v2 = vmul.f32 0.5, %v1639_v12  ;;  %v2023_v15 = vpop.f32.mrb[15].mxu1 }
 0x7c2   : > { %v1921_v15 = vld [vmem:[%s2701_s13] ss:$0 sm:$0xff] }
 0x7c3   : > { %v2552_v16 = vadd.f32 %v1644_v2, %v2330_v0  ;;  %v1677_v0 = vld [vmem:[%s2698_s10 + $0x8] sm:$0xff] }
 0x7c4   : > { %v1680_v24 = vpack.c.bf16 %v1677_v0, %v1676_v23 }
 0x7c5   : > { %v1648_v17 = vsel %vm467_vm0, %v2552_v16, 0.0 }
 0x7c6   : > { %1649 = vadd.xlane.f32.xlu1 %v1648_v17  ;;  %2025 = vmatpush3.bf16.msra.mxu0 %v1680_v24 }
 0x7c7   : > { %2026 = vmatprep.subr.bf16.mxu0 %v2189_v10 }
 0x7ca   : > { %2027 = vmatpush3.bf16.msra.mxu0 %v1681_v28 }
 0x853   : > { %v1650_v18 = vpop.xlane.xlu1 %1649 }
 0x854   : > { %v1651_v19 = vmul.f32 0.03125, %v1650_v18 }
 0x856   : > { %v1652_v20 = vsub.f32 %v2552_v16, %v1651_v19 }
 0x858   : > { %v1653_v21 = vmul.f32 %v1652_v20, %v1652_v20 }
 0x85a   : > { %v1654_v22 = vsel %vm467_vm0, %v1653_v21, 0.0 }
 0x85b   : > { %1655 = vadd.xlane.f32.xlu0 %v1654_v22 }
 0x8e8   : > { %v1656_v35 = vpop.xlane.xlu0 %1655 }
 0x8e9   : > { %v1657_v36 = vmul.f32 0.03125, %v1656_v35 }
 0x8eb   : > { %v1658_v37 = vadd.f32 1e-05, %v1657_v36 }
 0x8ed   : > { %2121 = vrsqrt.f32 %v1658_v37 }
 0x8f7   : > { %v2122_v38 = vpop.eup %2121 }
 0x8f8   : > { %v1660_v40 = vmul.f32 %v2122_v38, %v1652_v20 }
 0x8fa   : > { %v1667_v42 = vmul.f32 %v1917_v39, %v1660_v40 }
 0x8fc   : > { %v1674_v44 = vadd.f32 %v1918_v41, %v1667_v42 }
 0x8fe   : > { %v1675_v45 = vpack.c.bf16 %v1674_v44, %v1674_v44 }
 0x900   : > { %2029 = vmatmul.mubr.msk.bf16.vlgmr.msra.gmra.mrb[24].mxu0 %vm467_vm0, %v1675_v45 }
 0x9d3   : > { %v1726_v4 = vpop.f32.mrb[24].mxu0 }
 0x9d4   : > { %v1727_v43 = vadd.f32 %v1919_v3, %v1726_v4  ;;  %v2030_v5 = vpop.f32.mrb[25].mxu0 }
 0x9d5   : > { %v1729_v6 = vpop.f32.mrb[26].mxu0 }
 0x9d6   : > { %v1733_v7 = vmul.f32 0.044715, %v1727_v43  ;;  %v2031_v8 = vpop.f32.mrb[27].mxu0  ;;  %v1732_v10 = vmul.f32 0.5, %v1727_v43 }
 0x9d8   : > { %v1734_v9 = vmul.f32 %v1733_v7, %v1727_v43 }
 0x9da   : > { %v1735_v53 = vmul.f32 %v1734_v9, %v1727_v43 }
 0x9dc   : > { %v1736_v11 = vadd.f32 %v1735_v53, %v1727_v43 }
 0x9de   : > { %v1737_v63 = vmul.f32 0.7978846, %v1736_v11 }
 0x9e0   : > { %2123 = vtanh.f32 %v1737_v63 }
 0x9ea   : > { %v2124_v12 = vpop.eup %2123 }
 0x9eb   : > { %v1739_v13 = vadd.f32 1.0, %v2124_v12 }
 0x9ed   : > { %v1740_v14 = vmul.f32 %v1739_v13, %v1732_v10 }
 0x9ef   : > { %v1741_v2 = vpack.c.bf16 %v1740_v14, %v1740_v14 }
 0x9f1   : > { %2049 = vmatmul.mubr.bf16.vlgmr.msra.gmra.mrb[16].mxu1 %v1741_v2 }
 0xac4   : > { %v1807_v17 = vpop.f32.mrb[16].mxu1 }
 0xac5   : > { %v1808_v18 = vadd.f32 %v1921_v15, %v1807_v17  ;;  %v2050_v19 = vpop.f32.mrb[17].mxu1 }
 0xac6   : > { %v1810_v20 = vpop.f32.mrb[18].mxu1 }
 0xac7   : > { %v1813_v21 = vmul.f32 0.5, %v1808_v18  ;;  %v2051_v22 = vpop.f32.mrb[19].mxu1 }
 0xac9   : > { %v1814_v23 = vadd.f32 %v1813_v21, %v2552_v16 }
 0xacb   : > { %1815 = vst.msk [vmem:[%s458_s21] sm:$0xff] %vm467_vm0, %v1814_v23 }
 0xacc   : > { %2138 = shalt.err (!%p2135_p3)
}
 0xacd   : > { %s2139_s27 = scalar_lea.hbm %s2645_s2, 128  ;;  %s2143_s26 = scalar_lea.hbm %s2702_s14, 256 }
 0xace   : > { %p2140_p4 = scmp.ne.s32.totalorder %s2645_s2, %s2139_s27  ;;  %p2144_p9 = scmp.lt.u32.totalorder %s2645_s2, %s2702_s14 }
 0xacf   : > { %p2145_p10 = scmp.lt.u32.totalorder %s2143_s26, %s2139_s27  ;;  %p2147_p12 = scmp.lt.u32.totalorder %s2139_s27, %s2645_s2 }
 0xad0   : > { %p2141_p7 = pnand %p2140_p4, %p2315_p5 }
 0xad1   : > { %p2146_p11 = por %p2145_p10, %p2144_p9 }
 0xad2   : > { %p2142_p8 = pneg %p2141_p7 }
 0xad3   : > { %p2148_p13 = por %p2147_p12, %p2146_p11 }
 0xad5   : > { %p2149_p0 = pnand %p2148_p13, %p2142_p8 }
 0xad7   : > { %2152 = shalt.err (!%p2149_p0)
}
 0xad8   : > { %2052 = dma.vmem_to_hbm [thread:$0]  (%p2315_p5), %s2647_s25, 128, %s2645_s2, %s1817_s18  }
 0xad9 PF: > { %p2058_p1 = scmp.ge.s32.totalorder %s2187_s16, 2  ;;  %s1842_s3 = sand.u32 1, %s2175_s29  }
 0xada   : > { %s1843_s17 = scalar_lea.sflag [#allocation3], %s1842_s3 }
 0xadb   : > { %p2055_p2 = pnand %p2058_p1, %p2319_p6 }
 0xadd   : > { %2170 = dma.done.wait (!%p2055_p2), %s1843_s17, 128  }
 0xade   : > { %2172 = vsyncadd (!%p2055_p2), %s1843_s17, 4294967168  ;;  %p24_p3 = scmp.ge.s32.totalorder %s2302_s19, 4   ;;  %s2713_s29 = smov %s2179_s30 }
 0xadf   : > { %s2714_s30 = smov %s2183_s15  ;;  %s2715_s15 = smov %s2313_s22 }
 0xae0   : > { %s2716_s16 = smov %s2302_s19  ;;  %26 = sbr.rel (!%p24_p3) target bundleno = 8 (0x8), region = 111 }
 0xae7   :  { %1848 = vsyncpa [#allocation3], 1 }
 0xae8   :  { %1850 = vsyncpa [#allocation3 + $0x1], 1 }

</bundles_post_ra>
